<compile_context>
chip_gen: v7x
topology: tpu7x:2x2x1
jax: 0.10.0
libtpu: 0.0.40
codegen_flags: <defaults>
</compile_context>

<pallas_src>
import functools

import jax
import jax.numpy as jnp
from jax.experimental import pallas as pl
from jax.experimental.pallas import tpu as pltpu


def _modality_attention_kernel(x_ref, w_ref, b_ref, o_ref,
                               *, modality_num: int, embedding_size: int):
    """One grid step processes a (tm, D) tile of rows.

    Hot path done in-kernel:
      att    = sigmoid(x @ W + b)                 (MXU bf16 + VPU/EUP in f32)
      alpha  = softmax over the modality axis     (EUP exp + approx rcp)
      out    = sum_m alpha_m * x_m                (VPU, f32)
    """
    x = x_ref[...]                                    # (tm, D) f32
    w = w_ref[...]                                    # (D, D)  bf16 (pre-transposed)
    b = b_ref[...]                                    # (1, D)  f32

    # Linear layer: bf16 operands into the MXU, f32 accumulation.
    logits = jnp.dot(x.astype(jnp.bfloat16), w,
                     preferred_element_type=jnp.float32) + b
    att = jax.nn.sigmoid(logits)                      # (tm, D) f32
    exp_att = jnp.exp(att)                            # (tm, D) f32
    # sigmoid output is in (0,1) -> exp is bounded, no max-subtraction needed.

    E = embedding_size

    # Hoist all modality slices once (JAX does not CSE repeated slices
    # inside the traced body).  E is a multiple of 128 -> lane-aligned slices.
    exp_slices = [exp_att[:, m * E:(m + 1) * E] for m in range(modality_num)]
    x_slices = [x[:, m * E:(m + 1) * E] for m in range(modality_num)]

    sum_exp = exp_slices[0]
    for m in range(1, modality_num):
        sum_exp = sum_exp + exp_slices[m]

    # Approx reciprocal lowers to the EUP (otherwise idle) -> near-free.
    inv_sum = pl.reciprocal(sum_exp, approx=True)     # (tm, E)

    # Weighted sum of modality slices of x (all f32 on the VPU).
    acc = (exp_slices[0] * inv_sum) * x_slices[0]
    for m in range(1, modality_num):
        acc = acc + (exp_slices[m] * inv_sum) * x_slices[m]

    o_ref[...] = acc.astype(o_ref.dtype)


def prepare_params(weight, bias):
    """One-time parameter prep; call at load time, NOT per forward pass.

    weight: torch-layout (out_features, in_features) f32
    bias:   (D,) f32
    Returns (w_t, b2d): transposed bf16 weight so the kernel computes
    x @ w_t == x @ W^T, and a (1, D) f32 bias row.
    """
    w_t = jnp.asarray(weight).T.astype(jnp.bfloat16)
    b2d = jnp.asarray(bias).reshape(1, -1).astype(jnp.float32)
    return w_t, b2d


def _round_up(n: int, m: int) -> int:
    return ((n + m - 1) // m) * m


def modality_attention(x, w_t, b2d, *, modality_num: int,
                       embedding_size: int, tm: int = 512):
    """x: (B, S, D) f32 with D = modality_num * embedding_size.
    w_t: (D, D) bf16, already transposed (from prepare_params).
    b2d: (1, D) f32.
    Returns (B, S, embedding_size)."""
    B, S, D = x.shape
    assert D == modality_num * embedding_size
    M = B * S

    # Adaptive row tile: as large as requested (feeds the MXU / amortizes the
    # ~0.35us per-grid-step overhead), but capped so large inputs still give
    # >=~8 grid steps for the megacore 'parallel' axis.  Padded instead of
    # asserting divisibility.
    tm_eff = max(8, min(tm, _round_up(pl.cdiv(M, 8), 8)))
    M_pad = _round_up(M, tm_eff)

    x2d = x.reshape(M, D)
    if M_pad != M:
        # Zero rows are harmless: alpha is finite and x_m == 0 -> output 0.
        x2d = jnp.pad(x2d, ((0, M_pad - M), (0, 0)))

    kernel = functools.partial(
        _modality_attention_kernel,
        modality_num=modality_num,
        embedding_size=embedding_size,
    )

    out2d = pl.pallas_call(
        kernel,
        out_shape=jax.ShapeDtypeStruct((M_pad, embedding_size), x.dtype),
        grid_spec=pltpu.PrefetchScalarGridSpec(
            num_scalar_prefetch=0,
            grid=(M_pad // tm_eff,),
            in_specs=[
                pl.BlockSpec((tm_eff, D), lambda i: (i, 0)),   # x rows tile
                # Constant index maps -> Pallas does not re-issue these DMAs
                # per grid step.  TODO(synk): for large D, K-tile the weight
                # over an 'arbitrary' axis and set vmem_limit_bytes (v7x 64MiB).
                pl.BlockSpec((D, D), lambda i: (0, 0)),        # full bf16 weight
                pl.BlockSpec((1, D), lambda i: (0, 0)),        # bias row
            ],
            # E is a multiple of 128 -> lane-dense, unmasked full-lane stores.
            out_specs=pl.BlockSpec((tm_eff, embedding_size), lambda i: (i, 0)),
        ),
        compiler_params=pltpu.CompilerParams(
            dimension_semantics=("parallel",),
        ),
    )(x2d, w_t, b2d)

    return out2d[:M].reshape(B, S, embedding_size)


def _reference(x, weight, bias, modality_num, embedding_size):
    """Pure-JAX f32 reference mirroring the PyTorch forward (dropout = identity)."""
    att = jax.nn.sigmoid(jnp.einsum("bsd,od->bso", x, weight) + bias)
    B, S, D = x.shape
    E = embedding_size
    att_m = att.reshape(B, S, modality_num, E)
    x_m = x.reshape(B, S, modality_num, E)
    exp_att = jnp.exp(att_m)
    alpha = exp_att / jnp.sum(exp_att, axis=2, keepdims=True)
    return jnp.sum(alpha * x_m, axis=2)


if __name__ == "__main__":
    # Small, deterministic config: modality_num=2, embedding_size=128 -> D=256.
    modality_num = 2
    embedding_size = 128
    D = modality_num * embedding_size
    B, S = 2, 8

    key = jax.random.PRNGKey(0)
    kx, kw, kb = jax.random.split(key, 3)
    x = jax.random.normal(kx, (B, S, D), dtype=jnp.float32)
    # nn.Linear-style deterministic init: uniform(-1/sqrt(D), 1/sqrt(D)).
    bound = 1.0 / (D ** 0.5)
    weight = jax.random.uniform(kw, (D, D), jnp.float32, -bound, bound)
    bias = jax.random.uniform(kb, (D,), jnp.float32, -bound, bound)

    # One-time param prep (transpose + bf16 cast) outside the hot path.
    w_t, b2d = prepare_params(weight, bias)

    out = modality_attention(
        x, w_t, b2d,
        modality_num=modality_num, embedding_size=embedding_size, tm=512,
    )
    out = jax.block_until_ready(out)

    ref = _reference(x, weight, bias, modality_num, embedding_size)
    assert out.shape == (B, S, embedding_size), out.shape
    # Tolerance relaxed for bf16 MXU operands + approx EUP reciprocal.
    assert jnp.allclose(out, ref, atol=2e-2, rtol=2e-2), "mismatch vs reference"

    print("KERNEL_OK")
</pallas_src>

<mosaic_0001>
module attributes {stable_mosaic.version = 11 : i64} {
  func.func @_modality_attention_kernel(%arg0: i32, %arg1: memref<8x256xf32, #tpu.memory_space<vmem>>, %arg2: memref<256x256xbf16, #tpu.memory_space<vmem>>, %arg3: memref<1x256xf32, #tpu.memory_space<vmem>>, %arg4: memref<8x128xf32, #tpu.memory_space<vmem>>) attributes {dimension_semantics = [#tpu.dimension_semantics<parallel>], iteration_bounds = array<i64: 2>, scalar_prefetch = 0 : i64, scratch_operands = 0 : i64, tpu.core_type = #tpu.core_type<tc>, window_params = [{transform_indices = @transform_0, window_bounds = array<i64: 8, 256>}, {pipeline_mode = #tpu.pipeline_mode<synchronous>, transform_indices = @transform_1, window_bounds = array<i64: 256, 256>}, {pipeline_mode = #tpu.pipeline_mode<synchronous>, transform_indices = @transform_2, window_bounds = array<i64: 1, 256>}, {transform_indices = @transform_3, window_bounds = array<i64: 8, 128>}]} {
    %c0 = arith.constant 0 : index
    %c0_0 = arith.constant 0 : index
    %0 = vector.load %arg1[%c0, %c0_0] : memref<8x256xf32, #tpu.memory_space<vmem>>, vector<8x256xf32>
    %c0_1 = arith.constant 0 : index
    %c0_2 = arith.constant 0 : index
    %1 = vector.load %arg2[%c0_1, %c0_2] : memref<256x256xbf16, #tpu.memory_space<vmem>>, vector<256x256xbf16>
    %c0_3 = arith.constant 0 : index
    %c0_4 = arith.constant 0 : index
    %2 = vector.load %arg3[%c0_3, %c0_4] : memref<1x256xf32, #tpu.memory_space<vmem>>, vector<1x256xf32>
    %3 = arith.truncf %0 : vector<8x256xf32> to vector<8x256xbf16>
    %cst = arith.constant dense<0.000000e+00> : vector<8x256xf32>
    %4 = tpu.matmul %3, %1, %cst {dimension_numbers = #tpu.dot_dimension_numbers<[1], [0], [0], [1], [0, 0, 1, 1], [], []>} : vector<8x256xbf16>, vector<256x256xbf16>, vector<8x256xf32> -> vector<8x256xf32>
    %5 = vector.broadcast %2 : vector<1x256xf32> to vector<8x256xf32>
    %6 = arith.addf %4, %5 : vector<8x256xf32>
    %7 = arith.negf %6 : vector<8x256xf32>
    %8 = math.exp %7 : vector<8x256xf32>
    %cst_5 = arith.constant 1.000000e+00 : f32
    %9 = vector.broadcast %cst_5 : f32 to vector<8x256xf32>
    %10 = arith.addf %9, %8 : vector<8x256xf32>
    %11 = arith.divf %9, %10 : vector<8x256xf32>
    %12 = math.exp %11 : vector<8x256xf32>
    %13 = vector.extract_strided_slice %12 {offsets = [0, 0], sizes = [8, 128], strides = [1, 1]} : vector<8x256xf32> to vector<8x128xf32>
    %14 = vector.extract_strided_slice %12 {offsets = [0, 128], sizes = [8, 128], strides = [1, 1]} : vector<8x256xf32> to vector<8x128xf32>
    %15 = vector.extract_strided_slice %0 {offsets = [0, 0], sizes = [8, 128], strides = [1, 1]} : vector<8x256xf32> to vector<8x128xf32>
    %16 = vector.extract_strided_slice %0 {offsets = [0, 128], sizes = [8, 128], strides = [1, 1]} : vector<8x256xf32> to vector<8x128xf32>
    %17 = arith.addf %13, %14 : vector<8x128xf32>
    %18 = tpu.reciprocal %17 {approx = true} : vector<8x128xf32> -> vector<8x128xf32>
    %19 = arith.mulf %13, %18 : vector<8x128xf32>
    %20 = arith.mulf %19, %15 : vector<8x128xf32>
    %21 = arith.mulf %14, %18 : vector<8x128xf32>
    %22 = arith.mulf %21, %16 : vector<8x128xf32>
    %23 = arith.addf %20, %22 : vector<8x128xf32>
    %c0_6 = arith.constant 0 : index
    %c0_7 = arith.constant 0 : index
    %24 = vector.load %arg4[%c0_6, %c0_7] : memref<8x128xf32, #tpu.memory_space<vmem>>, vector<8x128xf32>
    tpu.vector_store %arg4[%c0_6, %c0_7], %23 {strides = array<i32>} : memref<8x128xf32, #tpu.memory_space<vmem>>, vector<8x128xf32>,
    return
  }
  func.func @transform_0(%arg0: i32) -> (i32, i32) {
    %c0_i32 = arith.constant 0 : i32
    %c0_i32_0 = arith.constant 0 : i32
    return %arg0, %c0_i32 : i32, i32
  }
  func.func @transform_1(%arg0: i32) -> (i32, i32) {
    %c0_i32 = arith.constant 0 : i32
    %c0_i32_0 = arith.constant 0 : i32
    %c0_i32_1 = arith.constant 0 : i32
    return %c0_i32, %c0_i32_0 : i32, i32
  }
  func.func @transform_2(%arg0: i32) -> (i32, i32) {
    %c0_i32 = arith.constant 0 : i32
    %c0_i32_0 = arith.constant 0 : i32
    %c0_i32_1 = arith.constant 0 : i32
    return %c0_i32, %c0_i32_0 : i32, i32
  }
  func.func @transform_3(%arg0: i32) -> (i32, i32) {
    %c0_i32 = arith.constant 0 : i32
    %c0_i32_0 = arith.constant 0 : i32
    return %arg0, %c0_i32 : i32, i32
  }
}

</mosaic_0001>

<bundles_post_ra>
// kernel: tpu_custom_call.1
= control target key start
LH: loop header
LB: loop body
LE: loop exit
PB: predicated region body
PF: predicated region fallthrough
CT: control target
= control target key end

     0   :  { %8 = vsyncpa [#allocation3], 0  ;;  %s1104_s0 = inlined_call_operand.hbm [shape: f32[16,256], index: 0, kind: input, shape index: {}]   ;;  %s1105_s1 = inlined_call_operand.hbm [shape: bf16[256,256], index: 1, kind: input, shape index: {}]   ;;  %s1106_s2 = inlined_call_operand.vmem [shape: f32[1,256], index: 2, kind: input, shape index: {}]   ;;  %s1107_s3 = inlined_call_operand.hbm [shape: f32[16,128], index: 3, kind: output, shape index: {}]  }
   0x1   :  { %10 = vsyncpa [#allocation3 + $0x1], 0 }
   0x2   :  { %11 = vsyncpa [#allocation6], 0 }
   0x3   :  { %12 = vsyncpa [#allocation4], 0 }
   0x4   :  { %14 = vsyncpa [#allocation4 + $0x1], 0  ;;  %s895_s12 = smov 0   ;;  %s897_s13 = smov 0  }
   0x5   :  { %s899_s14 = smov 0   ;;  %s901_s15 = smov 0  }
   0x6 LB: > { %s916_s16 = sadd.s32 4294967295, %s868_s15   ;;  %s569_s17 = sadd.s32 4294967294, %s868_s15   ;;  %s868_s15 = sphi %s901_s15, %s1127_s15   ;;  %s864_s14 = sphi %s899_s14, %s1126_s14   ;;  %s860_s13 = sphi %s897_s13, %s1125_s13   ;;  %s856_s12 = sphi %s895_s12, %s1124_s12  }
   0x7   : > { %p40_p0 = scmp.ne.s32.totalorder %s860_s13, %s856_s12  ;;  %p1108_p1 = scmp.eq.s32.totalorder %s916_s16, 0 }
   0x8   : > { %p112_p3 = scmp.eq.s32.totalorder %s569_s17, 1  ;;  %p570_p5 = scmp.ge.s32.totalorder %s868_s15, 1 }
   0x9   : > { %p925_p4 = por %p1108_p1, %p40_p0  ;;  %p119_p7 = scmp.lt.s32.totalorder %s868_s15, 3 }
   0xa   : > { %p930_p6 = por %p112_p3, %p40_p0  ;;  %s870_s21 = smov [#allocation5]  }
   0xb   : > { %s1111_s18 = scalar_select %p925_p4, 1, 0 }
   0xc   : > { %s1112_s19 = scalar_select %p930_p6, 1, 0 }
   0xd   : > { %p935_p8 = pnand %p570_p5, %p119_p7  ;;  %s131_s22 = sshll.u32 %s870_s21, 4  ;;  %s939_s22 = int_to_ptr.vmem [resolvable:$true] %s131_s22 }
   0xe   : > { %s951_s24 = sadd.s32 1, %s868_s15   ;;  %s27_s25 = sadd.s32 1, %s864_s14 }
   0xf   : > { %s1113_s20 = scalar_select %p935_p8, 1, 0 }
  0x10   : > { %p627_p9 = pneg %p935_p8  ;;  %s24_s26 = ssub.s32 %s868_s15, %s951_s24 }
  0x11   : > { %s740_s29 = scalar_lea.hbm %s1105_s1, 4096 }
  0x12   : > { %p946_p11 = pnand %p627_p9, %p1108_p1  ;;  %p741_p12 = scmp.ne.s32.totalorder %s1105_s1, %s740_s29 }
  0x13   : > { %p747_p5 = scmp.lt.u32.totalorder %s740_s29, %s1105_s1 }
  0x14   : > { %p742_p13 = pneg %p946_p11 }
  0x16   : > { %p743_p0 = pnand %p742_p13, %p741_p12 }
  0x18   : > { %p744_p3 = pneg %p743_p0 }
  0x1a   : > { %p749_p7 = pnand %p747_p5, %p744_p3 }
  0x1c   : > { %752 = shalt.err (!%p749_p7)
}
  0x1d   : > { %s753_s7 = scalar_lea.vmem %s939_s22, 4096  ;;  %p761_p2 = scmp.lt.s32.totalorder %s939_s22, %s939_s22 }
  0x1e   : > { %p754_p9 = scmp.ne.s32.totalorder %s939_s22, %s753_s7  ;;  %p762_p6 = scmp.lt.s32.totalorder %s753_s7, %s753_s7 }
  0x20   : > { %p756_p10 = pnand %p754_p9, %p742_p13  ;;  %p763_p4 = por %p762_p6, %p761_p2 }
  0x22   : > { %p757_p1 = pneg %p756_p10 }
  0x24   : > { %p764_p8 = pnand %p763_p4, %p757_p1 }
  0x26   : > { %767 = shalt.err (!%p764_p8)
}
  0x27   : > { %s871_s8 = smov 128   ;;  %s872_s9 = smov 8  }
  0x28   : > { %630 = dma.hbm_to_vmem [thread:$0]  (!%p946_p11), %s1105_s1, 4096, %s939_s22, [#allocation6], %s871_s8, %s871_s8, %s872_s9  }
  0x29   : > { %p25_p2 = scmp.eq.s32.totalorder %s24_s26, 0  ;;  %p34_p1 = scmp.ne.s32.totalorder %s864_s14, %s860_s13 }
  0x2a   : > { %p35_p4 = scmp.eq.s32.totalorder %s868_s15, 0  ;;  %p640_p6 = scmp.lt.s32.totalorder %s868_s15, 2 }
  0x2b   : > { %s982_s17 = scalar_select %p25_p2, %s864_s14, %s27_s25  }
  0x2c   : > { %p36_p8 = por %p35_p4, %p34_p1  ;;  %p1115_p10 = scmp.eq.s32.totalorder %s916_s16, 1 }
  0x2d   : > { %s148_s27 = sand.u32 1, %s864_s14   ;;  %s618_s28 = sshll.u32 %s868_s15, 8 }
  0x2e   : > { %p986_p12 = por %p1115_p10, %p34_p1  ;;  %s573_s29 = sshll.u32 %s148_s27, 4 }
  0x2f   : > { %s995_s4 = scalar_lea.hbm %s1104_s0, %s618_s28  ;;  %s152_s22 = scalar_lea.vmem [#allocation2], %s573_s29 }
  0x30   : > { %s160_s25 = sshll.u32 %s152_s22, 4  ;;  %p997_p11 = pnand %p640_p6, %p36_p8  ;;  %s1001_s25 = int_to_ptr.vmem [resolvable:$true] %s160_s25 }
  0x31   : > { %s149_s5 = scalar_lea.sflag [#allocation3], %s148_s27  ;;  %s768_s6 = scalar_lea.hbm %s995_s4, 256 }
  0x32   : > { %p769_p13 = scmp.ne.s32.totalorder %s995_s4, %s768_s6  ;;  %p770_p0 = pneg %p997_p11 }
  0x33   : > { %s773_s9 = scalar_lea.hbm %s1104_s0, 512  ;;  %p774_p7 = scmp.lt.u32.totalorder %s995_s4, %s1104_s0 }
  0x34   : > { %p771_p3 = pnand %p770_p0, %p769_p13  ;;  %p775_p9 = scmp.lt.u32.totalorder %s773_s9, %s768_s6 }
  0x35   : > { %p777_p1 = scmp.lt.u32.totalorder %s768_s6, %s995_s4 }
  0x36   : > { %p772_p5 = pneg %p771_p3  ;;  %p776_p2 = por %p775_p9, %p774_p7 }
  0x38   : > { %p778_p4 = por %p777_p1, %p776_p2 }
  0x3a   : > { %p779_p6 = pnand %p778_p4, %p772_p5 }
  0x3c   : > { %782 = shalt.err (!%p779_p6)
}
  0x3d   : > { %s783_s27 = scalar_lea.vmem %s1001_s25, 256  ;;  %s873_s28 = smov [#allocation2]  }
  0x3e   : > { %p784_p8 = scmp.ne.s32.totalorder %s1001_s25, %s783_s27  ;;  %s788_s29 = sshll.u32 %s873_s28, 4  ;;  %s789_s29 = int_to_ptr.vmem [resolvable:$false] %s788_s29 }
  0x3f   : > { %s790_s23 = scalar_lea.vmem %s789_s29, 512  ;;  %p791_p3 = scmp.lt.s32.totalorder %s1001_s25, %s789_s29 }
  0x40   : > { %p786_p10 = pnand %p784_p8, %p770_p0  ;;  %p792_p7 = scmp.lt.s32.totalorder %s790_s23, %s783_s27 }
  0x42   : > { %p787_p13 = pneg %p786_p10  ;;  %p793_p9 = por %p792_p7, %p791_p3 }
  0x44   : > { %p794_p2 = pnand %p793_p9, %p787_p13 }
  0x46   : > { %797 = shalt.err (!%p794_p2)
}
  0x47   : > { %634 = dma.hbm_to_vmem [thread:$0]  (!%p997_p11), %s995_s4, 256, %s1001_s25, %s149_s5  }
  0x48   : > { %p1118_p5 = scmp.ne.s32.totalorder %s1113_s20, 0 }
  0x49   : > { %s1031_s30 = sand.u32 (!%p1118_p5), 1, %s860_s13   ;;  %p1119_p0 = scmp.ne.s32.totalorder (!%p1118_p5), %s1111_s18, 0 }
  0x4a   : > { %169 = sbr.rel (%p1118_p5) target bundleno = 437 (0x1b5), region = 32  ;;  %s577_s22 = sshll.u32 (!%p1118_p5), %s1031_s30, 4 }
  0x4b   : > { %s172_s6 = scalar_lea.sflag (!%p1118_p5), [#allocation3], %s1031_s30  ;;  %s1035_s7 = scalar_lea.vmem (!%p1118_p5), [#allocation2], %s577_s22 }
  0x51   : > { %843 = dma.done.wait (%p1119_p0), %s172_s6, 256  }
  0x52   : > { %845 = vsyncadd (%p1119_p0), %s172_s6, 4294967040  ;;  %p1120_p11 = scmp.eq.s32.totalorder %s916_s16, 0 }
  0x54   : > { %847 = dma.done.wait (%p1120_p11), [#allocation6], 4096   ;;  %p1121_p1 = pmov %p1120_p11 }
  0x55   : > { %v678_v0 = vld [vmem:[#allocation5 + $0x4] ss:$8 sps:$4 sm:$0xff]   ;;  %v680_v1 = vld [vmem:[#allocation5] ss:$8 sps:$4 sm:$0xff]   ;;  %v681_v2 = vld [vmem:[#allocation5 + $0x14] ss:$8 sps:$4 sm:$0xff]   ;;  %v240_v36 = vlaneseq }
  0x56   : > { %849 = vsyncadd (%p1121_p1), [#allocation6], 4294963200  ;;  %410 = vmatprep.subr.bf16.mxu0 %v678_v0  ;;  %v683_v3 = vld [vmem:[#allocation5 + $0x10] ss:$8 sps:$4 sm:$0xff]   ;;  %v684_v4 = vld [vmem:[#allocation5 + $0x24] ss:$8 sps:$4 sm:$0xff]  }
  0x57   : > { %411 = vmatpush1.bf16.msra.mxu0 %v680_v1  ;;  %v686_v5 = vld [vmem:[#allocation5 + $0x20] ss:$8 sps:$4 sm:$0xff]   ;;  %v687_v6 = vld [vmem:[#allocation5 + $0x34] ss:$8 sps:$4 sm:$0xff]   ;;  %v689_v7 = vld [vmem:[#allocation5 + $0x30] ss:$8 sps:$4 sm:$0xff]  }
  0x58   : > { %412 = vmatprep.subr.bf16.mxu0 %v681_v2  ;;  %v690_v8 = vld [vmem:[#allocation5 + $0x44] ss:$8 sps:$4 sm:$0xff]   ;;  %v692_v9 = vld [vmem:[#allocation5 + $0x40] ss:$8 sps:$4 sm:$0xff]   ;;  %v693_v10 = vld [vmem:[#allocation5 + $0x54] ss:$8 sps:$4 sm:$0xff]  }
  0x59   : > { %v695_v11 = vld [vmem:[#allocation5 + $0x50] ss:$8 sps:$4 sm:$0xff]   ;;  %v696_v12 = vld [vmem:[#allocation5 + $0x64] ss:$8 sps:$4 sm:$0xff]   ;;  %v698_v15 = vld [vmem:[#allocation5 + $0x60] ss:$8 sps:$4 sm:$0xff]  }
  0x5a   : > { %v1046_v13 = vld [vmem:[%s1035_s7 + $0x8] sm:$0xff]  ;;  %v202_v34 = vld [vmem:[%s1035_s7] sm:$0xff]  ;;  %v241_v37 = vshrl.u32 %v240_v36, 7  ;;  %s579_s4 = sshll.u32 %s1031_s30, 3  ;;  %s615_s25 = sshll.u32 %s916_s16, 7 }
  0x5b   : > { %413 = vmatpush1.bf16.msra.mxu0 %v683_v3  ;;  %v238_v14 = vpack.c.bf16 %v1046_v13, %v1046_v13  ;;  %v699_v16 = vld [vmem:[#allocation5 + $0x74] ss:$8 sps:$4 sm:$0xff]   ;;  %v701_v17 = vld [vmem:[#allocation5 + $0x70] ss:$8 sps:$4 sm:$0xff]   ;;  %v702_v18 = vld [vmem:[#allocation5 + $0x84] ss:$8 sps:$4 sm:$0xff]   ;;  %v237_v35 = vpack.c.bf16 %v202_v34, %v202_v34  ;;  %s1060_s10 = scalar_lea.hbm %s1107_s3, %s615_s25 }
  0x5c   : > { %414 = vmatprep.subr.bf16.mxu0 %v684_v4  ;;  %v704_v19 = vld [vmem:[#allocation5 + $0x80] ss:$8 sps:$4 sm:$0xff]   ;;  %v705_v20 = vld [vmem:[#allocation5 + $0x94] ss:$8 sps:$4 sm:$0xff]   ;;  %v707_v21 = vld [vmem:[#allocation5 + $0x90] ss:$8 sps:$4 sm:$0xff]  }
  0x5d   : > { %442 = vmatprep.mubr.bf16.mxu0 %v238_v14  ;;  %v708_v22 = vld [vmem:[#allocation5 + $0xa4] ss:$8 sps:$4 sm:$0xff]   ;;  %v710_v23 = vld [vmem:[#allocation5 + $0xa0] ss:$8 sps:$4 sm:$0xff]   ;;  %v711_v24 = vld [vmem:[#allocation5 + $0xb4] ss:$8 sps:$4 sm:$0xff]  }
  0x5e   : > { %v713_v25 = vld [vmem:[#allocation5 + $0xb0] ss:$8 sps:$4 sm:$0xff]   ;;  %v714_v26 = vld [vmem:[#allocation5 + $0xc4] ss:$8 sps:$4 sm:$0xff]   ;;  %v716_v27 = vld [vmem:[#allocation5 + $0xc0] ss:$8 sps:$4 sm:$0xff]  }
  0x5f   : > { %415 = vmatpush1.bf16.msra.mxu0 %v686_v5  ;;  %v717_v28 = vld [vmem:[#allocation5 + $0xd4] ss:$8 sps:$4 sm:$0xff]   ;;  %v719_v29 = vld [vmem:[#allocation5 + $0xd0] ss:$8 sps:$4 sm:$0xff]   ;;  %v720_v30 = vld [vmem:[#allocation5 + $0xe4] ss:$8 sps:$4 sm:$0xff]  }
  0x60   : > { %416 = vmatprep.subr.bf16.mxu0 %v687_v6  ;;  %v722_v31 = vld [vmem:[#allocation5 + $0xe0] ss:$8 sps:$4 sm:$0xff]   ;;  %v723_v32 = vld [vmem:[#allocation5 + $0xf4] ss:$8 sps:$4 sm:$0xff]   ;;  %v725_v33 = vld [vmem:[#allocation5 + $0xf0] ss:$8 sps:$4 sm:$0xff]  }
  0x61   : > { %v242_v38 = vsub.s32 0, %v241_v37  ;;  %v236_v39 = vld [vmem:[%s1106_s2] sm:$0x3]  ;;  %v246_v40 = vsub.s32 1, %v241_v37  ;;  %s201_s26 = scalar_lea.vmem [#allocation7], %s579_s4  ;;  %s476_s11 = scalar_lea.sflag [#allocation4], %s1031_s30 }
  0x62   : > { %s489_s5 = sshll.u32 %s201_s26, 4  ;;  %s874_s16 = smov [#allocation7]   ;;  %s1062_s5 = int_to_ptr.vmem [resolvable:$true] %s489_s5 }
  0x63   : > { %417 = vmatpush1.bf16.msra.mxu0 %v689_v7  ;;  %v243_v41 = vrot.slane %v236_v39, %v242_v38  ;;  %v247_v42 = vrot.slane %v236_v39, %v246_v40  ;;  %s798_s27 = scalar_lea.vmem %s1062_s5, 128  ;;  %s802_s28 = sshll.u32 %s874_s16, 4  ;;  %s803_s28 = int_to_ptr.vmem [resolvable:$false] %s802_s28 }
  0x64   : > { %418 = vmatprep.subr.bf16.mxu0 %v690_v8  ;;  %p799_p4 = scmp.ne.s32.totalorder %s1062_s5, %s798_s27  ;;  %s804_s29 = scalar_lea.vmem %s803_s28, 256 }
  0x65   : > { %p805_p10 = scmp.lt.s32.totalorder %s1062_s5, %s803_s28  ;;  %p806_p13 = scmp.lt.s32.totalorder %s804_s29, %s798_s27 }
  0x66   : > { %p800_p6 = pnand %p799_p4, %p986_p12 }
  0x67   : > { %419 = vmatpush1.bf16.msra.mxu0 %v692_v9  ;;  %p807_p3 = por %p806_p13, %p805_p10 }
  0x68   : > { %420 = vmatprep.subr.bf16.mxu0 %v693_v10  ;;  %p801_p8 = pneg %p800_p6 }
  0x6a   : > { %p808_p7 = pnand %p807_p3, %p801_p8 }
  0x6b   : > { %421 = vmatpush1.bf16.msra.mxu0 %v695_v11 }
  0x6c   : > { %422 = vmatprep.subr.bf16.mxu0 %v696_v12 }
  0x6f   : > { %423 = vmatpush1.bf16.msra.mxu0 %v698_v15 }
  0x70   : > { %424 = vmatprep.subr.bf16.mxu0 %v699_v16 }
  0x73   : > { %425 = vmatpush1.bf16.msra.mxu0 %v701_v17 }
  0x74   : > { %426 = vmatprep.subr.bf16.mxu0 %v702_v18 }
  0x77   : > { %427 = vmatpush1.bf16.msra.mxu0 %v704_v19 }
  0x78   : > { %428 = vmatprep.subr.bf16.mxu0 %v705_v20 }
  0x7b   : > { %429 = vmatpush1.bf16.msra.mxu0 %v707_v21 }
  0x7c   : > { %430 = vmatprep.subr.bf16.mxu0 %v708_v22 }
  0x7f   : > { %431 = vmatpush1.bf16.msra.mxu0 %v710_v23 }
  0x80   : > { %432 = vmatprep.subr.bf16.mxu0 %v711_v24 }
  0x83   : > { %433 = vmatpush1.bf16.msra.mxu0 %v713_v25 }
  0x84   : > { %434 = vmatprep.subr.bf16.mxu0 %v714_v26 }
  0x87   : > { %435 = vmatpush1.bf16.msra.mxu0 %v716_v27 }
  0x88   : > { %436 = vmatprep.subr.bf16.mxu0 %v717_v28 }
  0x8b   : > { %437 = vmatpush1.bf16.msra.mxu0 %v719_v29 }
  0x8c   : > { %438 = vmatprep.subr.bf16.mxu0 %v720_v30 }
  0x8f   : > { %439 = vmatpush1.bf16.msra.mxu0 %v722_v31 }
  0x90   : > { %440 = vmatprep.subr.bf16.mxu0 %v723_v32 }
  0x93   : > { %441 = vmatpush1.bf16.msra.mxu0 %v725_v33 }
  0x96   : > { %443 = vmatmul.mubr.bf16.vlgmr.msra.gmra.mrb[0].mxu0 %v237_v35 }
 0x169   : > { %v444_v43 = vpop.f32.mrb[0].mxu0 }
 0x16a   : > { %v445_v44 = vadd.f32 %v444_v43, %v243_v41  ;;  %v446_v45 = vpop.f32.mrb[1].mxu0 }
 0x16b   : > { %v447_v46 = vadd.f32 %v446_v45, %v247_v42  ;;  %v448_v47 = vpop.f32.mrb[2].mxu0 }
 0x16c   : > { %v612_v48 = vmul.f32 -1.442695, %v445_v44  ;;  %v449_v49 = vpop.f32.mrb[3].mxu0 }
 0x16d   : > { %v613_v50 = vmul.f32 -1.442695, %v447_v46 }
 0x16e   : > { %726 = vpow2.f32 %v612_v48 }
 0x16f   : > { %728 = vpow2.f32 %v613_v50 }
 0x178   : > { %v727_v51 = vpop.eup %726 }
 0x179   : > { %v729_v52 = vpop.eup %728  ;;  %v457_v53 = vadd.f32 1.0, %v727_v51 }
 0x17a   : > { %v458_v54 = vadd.f32 1.0, %v729_v52 }
 0x17b   : > { %730 = vrcp.f32 %v457_v53 }
 0x17c   : > { %732 = vrcp.f32 %v458_v54 }
 0x185   : > { %v731_v55 = vpop.eup %730 }
 0x186   : > { %v733_v56 = vpop.eup %732  ;;  %v463_v57 = vmul.f32 1.442695, %v731_v55 }
 0x187   : > { %v465_v58 = vmul.f32 1.442695, %v733_v56 }
 0x188   : > { %734 = vpow2.f32 %v463_v57 }
 0x189   : > { %736 = vpow2.f32 %v465_v58 }
 0x192   : > { %v735_v59 = vpop.eup %734 }
 0x193   : > { %v737_v60 = vpop.eup %736 }
 0x194   : > { %v467_v61 = vadd.f32 %v737_v60, %v735_v59 }
 0x196   : > { %738 = vrcp.f32 %v467_v61 }
 0x1a0   : > { %v739_v62 = vpop.eup %738 }
 0x1a1   : > { %v469_v63 = vmul.f32 %v739_v62, %v735_v59  ;;  %v471_v0 = vmul.f32 %v739_v62, %v737_v60 }
 0x1a3   : > { %v470_v1 = vmul.f32 %v469_v63, %v202_v34  ;;  %v472_v2 = vmul.f32 %v471_v0, %v1046_v13 }
 0x1a5   : > { %v473_v3 = vadd.f32 %v472_v2, %v470_v1 }
 0x1a7   : > { %474 = vst [vmem:[%s201_s26] sm:$0xff] %v473_v3 }
 0x1a8   : > { %811 = shalt.err (!%p808_p7)
}
 0x1a9   : > { %s812_s23 = scalar_lea.hbm %s1060_s10, 128  ;;  %s816_s6 = scalar_lea.hbm %s1107_s3, 256 }
 0x1aa   : > { %p813_p9 = scmp.ne.s32.totalorder %s1060_s10, %s812_s23  ;;  %p817_p0 = scmp.lt.u32.totalorder %s1060_s10, %s1107_s3 }
 0x1ab   : > { %p818_p11 = scmp.lt.u32.totalorder %s816_s6, %s812_s23  ;;  %p820_p4 = scmp.lt.u32.totalorder %s812_s23, %s1060_s10 }
 0x1ac   : > { %p814_p2 = pnand %p813_p9, %p986_p12 }
 0x1ad   : > { %p819_p1 = por %p818_p11, %p817_p0 }
 0x1ae   : > { %p815_p5 = pneg %p814_p2 }
 0x1af   : > { %p821_p6 = por %p820_p4, %p819_p1 }
 0x1b1   : > { %p822_p8 = pnand %p821_p6, %p815_p5 }
 0x1b3   : > { %825 = shalt.err (!%p822_p8)
}
 0x1b4   : > { %625 = dma.vmem_to_hbm [thread:$0]  (%p986_p12), %s1062_s5, 128, %s1060_s10, %s476_s11  }
 0x1b5 PF: > { %s501_s20 = sand.u32 1, %s856_s12   ;;  %p1122_p10 = scmp.ne.s32.totalorder %s1112_s19, 0 }
 0x1b6   : > { %p1123_p13 = scmp.ge.s32.totalorder %s868_s15, 2  ;;  %s502_s4 = scalar_lea.sflag [#allocation4], %s501_s20 }
 0x1b8   : > { %p636_p3 = pnand %p1123_p13, %p1122_p10 }
 0x1ba   : > { %851 = dma.done.wait (!%p636_p3), %s502_s4, 128  }
 0x1bb   : > { %853 = vsyncadd (!%p636_p3), %s502_s4, 4294967168  ;;  %p17_p7 = scmp.ge.s32.totalorder %s951_s24, 4   ;;  %s1124_s12 = smov %s860_s13 }
 0x1bc   : > { %s1125_s13 = smov %s864_s14  ;;  %s1126_s14 = smov %s982_s17 }
 0x1bd   : > { %s1127_s15 = smov %s951_s24  ;;  %19 = sbr.rel (!%p17_p7) target bundleno = 6 (0x6), region = 81 }
 0x1c4   :  { %507 = vsyncpa [#allocation3], 1 }
 0x1c5   :  { %509 = vsyncpa [#allocation3 + $0x1], 1 }
 0x1c6   :  { %510 = vsyncpa [#allocation6], 1 }
 0x1c7   :  { %511 = vsyncpa [#allocation4], 1 }
 0x1c8   :  { %513 = vsyncpa [#allocation4 + $0x1], 1 }

</bundles_post_ra>
